<compile_context>
chip_gen: v5e
topology: v5e:2x2
jax: 0.10.0
libtpu: 0.0.40
codegen_flags: <defaults>
</compile_context>

<pallas_src>
import functools

import jax
import jax.numpy as jnp
from jax.experimental import pallas as pl
from jax.experimental.pallas import tpu as pltpu

_LANE = 128                 # vreg lane width (last dim)
_SUBLANE = 8                # vreg sublane count (second-to-last dim, f32)
_MIB = 1024 * 1024
_MIN_BATCH_TILE = 128       # never split the batch into tiles smaller than this
_MAX_BATCH_TILE = 1024      # per-step DMA / step-overhead sweet spot
_MAX_OUT_TILE = 4096


def _round_up(x, m):
    return ((x + m - 1) // m) * m


def _pad2(a, rows, cols):
    r, c = a.shape
    if r == rows and c == cols:
        return a
    return jnp.pad(a, ((0, rows - r), (0, cols - c)))


@functools.lru_cache(maxsize=None)
def _tpu_memory_config():
    """(vmem_budget, vmem_limit_bytes, two_tensorcores) — decided once per process."""
    try:
        cap = int(pltpu.get_tpu_info().vmem_capacity_bytes)
    except Exception:
        # Unknown backend / older JAX: conservative defaults that fit every generation.
        return 24 * _MIB, 32 * _MIB, False
    if cap <= 80 * _MIB:
        # v7x: 64 MiB VMEM per TensorCore, 2 TensorCores per chip.
        return 36 * _MIB, 48 * _MIB, True
    # v5e / v6e: 128 MiB physical VMEM, single TensorCore.
    return 64 * _MIB, 96 * _MIB, False


def decoder_kernel(x_ref, w1_ref, b1_ref, w2_ref, b2_ref, o_ref):
    # Linear 1 (latent -> intermediate) + bias + ReLU; f32 accumulation on the MXU.
    # Recomputed per output tile (outer grid axis); K=latent_dim is tiny so the
    # extra MXU work is negligible next to the w2 byte stream.
    h = jnp.dot(x_ref[...], w1_ref[...], preferred_element_type=jnp.float32)
    h = jnp.maximum(h + b1_ref[...], 0.0)
    # Linear 2: feed the MXU in the storage dtype — cast the *small* h tile down
    # (no-op for f32) rather than upcasting the big w2 tile to f32.
    y = jnp.dot(h.astype(w2_ref.dtype), w2_ref[...], preferred_element_type=jnp.float32)
    o_ref[...] = (y + b2_ref[...]).astype(o_ref.dtype)


def _vmem_bytes(bt, ot, l_pad, i_pad, itemsize, out_itemsize):
    """Honest per-step VMEM footprint: everything default double-buffered, plus the
    f32 intermediates h/y and the (possible) narrow copy of h before the 2nd dot."""
    db = 2
    buffers = itemsize * db * (bt * l_pad          # x tile
                               + l_pad * i_pad     # w1 (constant index; still 2 copies)
                               + _SUBLANE * i_pad  # b1 (sublane-padded)
                               + i_pad * ot        # w2 tile
                               + _SUBLANE * ot)    # b2 tile
    buffers += out_itemsize * db * bt * ot         # output tile
    scratch = 4 * bt * (i_pad + ot)                # f32 h and y
    scratch += itemsize * bt * i_pad               # h cast to storage dtype (worst case)
    return buffers + scratch


def _choose_tiles(batch, l_pad, i_pad, o_lane, itemsize, out_itemsize, budget, two_cores):
    """Pick (batch_tile, out_tile): as large as the generation-aware budget allows,
    with floors that avoid overhead-dominated slivers, and a 2-way split only when
    there are two TensorCores to feed."""
    b_all = _round_up(max(batch, 1), _SUBLANE)
    bt_floor = min(b_all, _MIN_BATCH_TILE)
    batch_tile = min(b_all, _MAX_BATCH_TILE)
    out_tile = min(o_lane, _MAX_OUT_TILE)

    def fits(bt, ot):
        return _vmem_bytes(bt, ot, l_pad, i_pad, itemsize, out_itemsize) <= budget

    # Shrink the output tile first (w2/b2/out are the dominant VMEM terms; more O
    # tiles only re-read the tiny x tile), then the batch tile down to its floor.
    while not fits(batch_tile, out_tile) and out_tile > _LANE:
        out_tile = max(_LANE, _round_up(out_tile // 2, _LANE))
    while not fits(batch_tile, out_tile) and batch_tile > bt_floor:
        batch_tile = max(bt_floor, _round_up(batch_tile // 2, _SUBLANE))

    if two_cores and o_lane <= out_tile:
        # v7x: give the megacore split something to split.  Prefer halving the O
        # axis (each core then reads only half of w2 from HBM); fall back to the
        # batch axis only if it stays >= the minimum tile per core.
        if o_lane >= 2 * _LANE:
            out_tile = _round_up(pl.cdiv(o_lane, 2), _LANE)
        elif b_all >= 2 * bt_floor:
            batch_tile = min(batch_tile, _round_up(pl.cdiv(b_all, 2), _SUBLANE))

    return batch_tile, out_tile


def _build_decoder_call(b_pad, l_pad, i_pad, o_pad, batch_tile, out_tile, out_dtype,
                        vmem_limit, flops, bytes_accessed):
    n_i = b_pad // batch_tile
    n_j = o_pad // out_tile
    if n_j >= 2:
        # O tiles lead: w2/b2 resident across the inner batch sweep; on v7x the
        # leading parallel axis (O) is the one split across the two TensorCores.
        grid = (n_j, n_i)
        in_specs = [
            pl.BlockSpec((batch_tile, l_pad), lambda j, i: (i, 0)),   # x
            pl.BlockSpec((l_pad, i_pad), lambda j, i: (0, 0)),        # w1 (resident)
            pl.BlockSpec((1, i_pad), lambda j, i: (0, 0)),            # b1 (resident)
            pl.BlockSpec((i_pad, out_tile), lambda j, i: (0, j)),     # w2 (per O tile)
            pl.BlockSpec((1, out_tile), lambda j, i: (0, j)),         # b2 (per O tile)
        ]
        out_spec = pl.BlockSpec((batch_tile, out_tile), lambda j, i: (i, j))
    else:
        # Single O tile: lead with the batch axis so the multi-tile axis is the
        # splittable one (w2 residency is moot — there is only one w2 tile).
        grid = (n_i, n_j)
        in_specs = [
            pl.BlockSpec((batch_tile, l_pad), lambda i, j: (i, 0)),   # x
            pl.BlockSpec((l_pad, i_pad), lambda i, j: (0, 0)),        # w1
            pl.BlockSpec((1, i_pad), lambda i, j: (0, 0)),            # b1
            pl.BlockSpec((i_pad, out_tile), lambda i, j: (0, j)),     # w2
            pl.BlockSpec((1, out_tile), lambda i, j: (0, j)),         # b2
        ]
        out_spec = pl.BlockSpec((batch_tile, out_tile), lambda i, j: (i, j))

    return pl.pallas_call(
        decoder_kernel,
        out_shape=jax.ShapeDtypeStruct((b_pad, o_pad), out_dtype),
        grid_spec=pltpu.PrefetchScalarGridSpec(
            num_scalar_prefetch=0,
            grid=grid,
            in_specs=in_specs,
            out_specs=out_spec,
        ),
        compiler_params=pltpu.CompilerParams(
            dimension_semantics=("parallel", "parallel"),
            vmem_limit_bytes=vmem_limit,
        ),
        cost_estimate=pl.CostEstimate(
            flops=flops, transcendentals=0, bytes_accessed=bytes_accessed),
    )


def decoder_forward(x, w1, b1, w2, b2, *, batch_tile=None, out_tile=None):
    """Fused Decoder MLP: relu(x @ w1 + b1) @ w2 + b2 as a single Pallas kernel.

    x  : (B, latent_dim)
    w1 : (latent_dim, intermediate_dim),   b1 : (intermediate_dim,) or (1, intermediate_dim)
    w2 : (intermediate_dim, original_dim), b2 : (original_dim,)    or (1, original_dim)
    returns (B, original_dim) with x's dtype.
    """
    b1 = b1.reshape(1, -1)
    b2 = b2.reshape(1, -1)
    B, L = x.shape
    I = w1.shape[1]
    O = w2.shape[1]
    itemsize = jnp.dtype(x.dtype).itemsize
    out_itemsize = itemsize

    # Lane-dense padding of the feature dims -> unmasked VPU/MXU ops and stores.
    l_pad = _round_up(L, _LANE)
    i_pad = _round_up(I, _LANE)
    o_lane = _round_up(O, _LANE)

    budget, vmem_limit, two_cores = _tpu_memory_config()
    auto_bt, auto_ot = _choose_tiles(B, l_pad, i_pad, o_lane,
                                     itemsize, out_itemsize, budget, two_cores)
    batch_tile = auto_bt if batch_tile is None else _round_up(batch_tile, _SUBLANE)
    out_tile = auto_ot if out_tile is None else _round_up(out_tile, _LANE)

    b_pad = _round_up(max(B, 1), batch_tile)      # also handles ragged batches
    o_pad = _round_up(o_lane, out_tile)
    n_j = o_pad // out_tile

    x_p = _pad2(x, b_pad, l_pad)
    w1_p = _pad2(w1, l_pad, i_pad)
    b1_p = _pad2(b1, 1, i_pad)
    w2_p = _pad2(w2, i_pad, o_pad)
    b2_p = _pad2(b2, 1, o_pad)

    # Cost estimate on padded shapes; the first (tiny) matmul and the x read are
    # repeated once per O tile, w1/b1/w2/b2 are each read once, output written once.
    flops = 2 * b_pad * (n_j * l_pad * i_pad + i_pad * o_pad)
    bytes_accessed = (itemsize * (n_j * b_pad * l_pad
                                  + l_pad * i_pad + i_pad
                                  + i_pad * o_pad + o_pad)
                      + out_itemsize * b_pad * o_pad)

    call = _build_decoder_call(b_pad, l_pad, i_pad, o_pad, batch_tile, out_tile,
                               x.dtype, vmem_limit, flops, bytes_accessed)
    out_p = call(x_p, w1_p, b1_p, w2_p, b2_p)
    return out_p[:B, :O]


def init_decoder_params(key, latent_dim, intermediate_dim, original_dim, dtype=jnp.float32):
    """Deterministic init mirroring nn.Linear's default U(-1/sqrt(fan_in), 1/sqrt(fan_in))."""
    k1, k2, k3, k4 = jax.random.split(key, 4)
    bound1 = 1.0 / jnp.sqrt(latent_dim)
    bound2 = 1.0 / jnp.sqrt(intermediate_dim)
    w1 = jax.random.uniform(k1, (latent_dim, intermediate_dim), dtype, -bound1, bound1)
    b1 = jax.random.uniform(k2, (1, intermediate_dim), dtype, -bound1, bound1)
    w2 = jax.random.uniform(k3, (intermediate_dim, original_dim), dtype, -bound2, bound2)
    b2 = jax.random.uniform(k4, (1, original_dim), dtype, -bound2, bound2)
    return w1, b1, w2, b2


def decoder_reference(x, w1, b1, w2, b2):
    """Pure-JAX reference for correctness checking."""
    h = jnp.maximum(x @ w1 + b1, 0.0)
    return h @ w2 + b2


if __name__ == "__main__":
    # Small shapes consistent with the module: Decoder(latent_dim=32,
    # intermediate_dim=128, original_dim=256) applied to a batch of 16 spots.
    latent_dim, intermediate_dim, original_dim = 32, 128, 256
    batch = 16

    key = jax.random.PRNGKey(0)
    k_x, k_p = jax.random.split(key)
    x = jax.random.normal(k_x, (batch, latent_dim), jnp.float32)
    w1, b1, w2, b2 = init_decoder_params(k_p, latent_dim, intermediate_dim, original_dim)

    out = jax.block_until_ready(decoder_forward(x, w1, b1, w2, b2))

    ref = decoder_reference(x, w1, b1, w2, b2)
    assert out.shape == (batch, original_dim)
    assert jnp.allclose(out, ref, atol=1e-4, rtol=1e-4), "Pallas output mismatch vs reference"

    print("KERNEL_OK")
</pallas_src>

<mosaic_0001>
module attributes {stable_mosaic.version = 11 : i64} {
  func.func @decoder_kernel(%arg0: i32, %arg1: i32, %arg2: memref<16x128xf32, #tpu.memory_space<vmem>>, %arg3: memref<128x128xf32, #tpu.memory_space<vmem>>, %arg4: memref<1x128xf32, #tpu.memory_space<vmem>>, %arg5: memref<128x256xf32, #tpu.memory_space<vmem>>, %arg6: memref<1x256xf32, #tpu.memory_space<vmem>>, %arg7: memref<16x256xf32, #tpu.memory_space<vmem>>) attributes {dimension_semantics = [#tpu.dimension_semantics<parallel>, #tpu.dimension_semantics<parallel>], iteration_bounds = array<i64: 1, 1>, scalar_prefetch = 0 : i64, scratch_operands = 0 : i64, tpu.core_type = #tpu.core_type<tc>, window_params = [{transform_indices = @transform_0, window_bounds = array<i64: 16, 128>}, {pipeline_mode = #tpu.pipeline_mode<synchronous>, transform_indices = @transform_1, window_bounds = array<i64: 128, 128>}, {pipeline_mode = #tpu.pipeline_mode<synchronous>, transform_indices = @transform_2, window_bounds = array<i64: 1, 128>}, {transform_indices = @transform_3, window_bounds = array<i64: 128, 256>}, {transform_indices = @transform_4, window_bounds = array<i64: 1, 256>}, {transform_indices = @transform_5, window_bounds = array<i64: 16, 256>}]} {
    %c0 = arith.constant 0 : index
    %c0_0 = arith.constant 0 : index
    %0 = vector.load %arg2[%c0, %c0_0] : memref<16x128xf32, #tpu.memory_space<vmem>>, vector<16x128xf32>
    %c0_1 = arith.constant 0 : index
    %c0_2 = arith.constant 0 : index
    %1 = vector.load %arg3[%c0_1, %c0_2] : memref<128x128xf32, #tpu.memory_space<vmem>>, vector<128x128xf32>
    %cst = arith.constant dense<0.000000e+00> : vector<16x128xf32>
    %2 = tpu.matmul %0, %1, %cst {dimension_numbers = #tpu.dot_dimension_numbers<[1], [0], [0], [1], [0, 0, 1, 1], [], []>} : vector<16x128xf32>, vector<128x128xf32>, vector<16x128xf32> -> vector<16x128xf32>
    %c0_3 = arith.constant 0 : index
    %c0_4 = arith.constant 0 : index
    %3 = vector.load %arg4[%c0_3, %c0_4] : memref<1x128xf32, #tpu.memory_space<vmem>>, vector<1x128xf32>
    %4 = vector.broadcast %3 : vector<1x128xf32> to vector<16x128xf32>
    %5 = arith.addf %2, %4 : vector<16x128xf32>
    %cst_5 = arith.constant 0.000000e+00 : f32
    %6 = vector.broadcast %cst_5 : f32 to vector<16x128xf32>
    %7 = arith.maximumf %5, %6 : vector<16x128xf32>
    %c0_6 = arith.constant 0 : index
    %c0_7 = arith.constant 0 : index
    %8 = vector.load %arg5[%c0_6, %c0_7] : memref<128x256xf32, #tpu.memory_space<vmem>>, vector<128x256xf32>
    %cst_8 = arith.constant dense<0.000000e+00> : vector<16x256xf32>
    %9 = tpu.matmul %7, %8, %cst_8 {dimension_numbers = #tpu.dot_dimension_numbers<[1], [0], [0], [1], [0, 0, 1, 1], [], []>} : vector<16x128xf32>, vector<128x256xf32>, vector<16x256xf32> -> vector<16x256xf32>
    %c0_9 = arith.constant 0 : index
    %c0_10 = arith.constant 0 : index
    %10 = vector.load %arg6[%c0_9, %c0_10] : memref<1x256xf32, #tpu.memory_space<vmem>>, vector<1x256xf32>
    %11 = vector.broadcast %10 : vector<1x256xf32> to vector<16x256xf32>
    %12 = arith.addf %9, %11 : vector<16x256xf32>
    %c0_11 = arith.constant 0 : index
    %c0_12 = arith.constant 0 : index
    %13 = vector.load %arg7[%c0_11, %c0_12] : memref<16x256xf32, #tpu.memory_space<vmem>>, vector<16x256xf32>
    tpu.vector_store %arg7[%c0_11, %c0_12], %12 {strides = array<i32>} : memref<16x256xf32, #tpu.memory_space<vmem>>, vector<16x256xf32>,
    return
  }
  func.func @transform_0(%arg0: i32, %arg1: i32) -> (i32, i32) {
    %c0_i32 = arith.constant 0 : i32
    %c0_i32_0 = arith.constant 0 : i32
    return %arg0, %c0_i32 : i32, i32
  }
  func.func @transform_1(%arg0: i32, %arg1: i32) -> (i32, i32) {
    %c0_i32 = arith.constant 0 : i32
    %c0_i32_0 = arith.constant 0 : i32
    %c0_i32_1 = arith.constant 0 : i32
    return %c0_i32, %c0_i32_0 : i32, i32
  }
  func.func @transform_2(%arg0: i32, %arg1: i32) -> (i32, i32) {
    %c0_i32 = arith.constant 0 : i32
    %c0_i32_0 = arith.constant 0 : i32
    %c0_i32_1 = arith.constant 0 : i32
    return %c0_i32, %c0_i32_0 : i32, i32
  }
  func.func @transform_3(%arg0: i32, %arg1: i32) -> (i32, i32) {
    %c0_i32 = arith.constant 0 : i32
    %c0_i32_0 = arith.constant 0 : i32
    return %c0_i32, %arg1 : i32, i32
  }
  func.func @transform_4(%arg0: i32, %arg1: i32) -> (i32, i32) {
    %c0_i32 = arith.constant 0 : i32
    %c0_i32_0 = arith.constant 0 : i32
    return %c0_i32, %arg1 : i32, i32
  }
  func.func @transform_5(%arg0: i32, %arg1: i32) -> (i32, i32) {
    %c0_i32 = arith.constant 0 : i32
    return %arg0, %arg1 : i32, i32
  }
}

</mosaic_0001>

<bundles_post_ra>
// kernel: tpu_custom_call.1
= control target key start
LH: loop header
LB: loop body
LE: loop exit
PB: predicated region body
PF: predicated region fallthrough
CT: control target
= control target key end

     0   :  { %10 = vsyncpa [#allocation3], 0  ;;  %s412_s0 = inlined_call_operand.hbm [shape: f32[16,128], index: 0, kind: input, shape index: {}]   ;;  %s413_s1 = inlined_call_operand.hbm [shape: f32[128,128], index: 1, kind: input, shape index: {}]   ;;  %s414_s2 = inlined_call_operand.vmem [shape: f32[1,128], index: 2, kind: input, shape index: {}]   ;;  %s415_s3 = inlined_call_operand.hbm [shape: f32[128,256], index: 3, kind: input, shape index: {}]   ;;  %s416_s4 = inlined_call_operand.vmem [shape: f32[1,256], index: 4, kind: input, shape index: {}]   ;;  %s417_s5 = inlined_call_operand.hbm [shape: f32[16,256], index: 5, kind: output, shape index: {}]  }
   0x1   :  { %11 = vsyncpa [#allocation6], 0 }
   0x2   :  { %12 = vsyncpa [#allocation4], 0  ;;  %s30_s20 = sshll.u32 %s413_s1, 4  ;;  %s350_s21 = smov [#allocation5]   ;;  %s31_s20 = int_to_ptr.hbm [resolvable:$true] %s30_s20 }
   0x3   :  { %s32_s22 = sshll.u32 %s350_s21, 4  ;;  %s17_s25 = sshll.u32 %s412_s0, 4  ;;  %s33_s22 = int_to_ptr.vmem [resolvable:$true] %s32_s22  ;;  %s18_s25 = int_to_ptr.hbm [resolvable:$true] %s17_s25 }
   0x4   :  { %s351_s26 = smov 128   ;;  %s352_s27 = smov 8  }
   0x5   :  { %38 = dma.hbm_to_vmem [thread:$0]  %s31_s20, 2048, %s33_s22, [#allocation6], %s351_s26, %s351_s26, %s352_s27  }
   0x6   :  { %s353_s28 = smov [#allocation2]   ;;  %s45_s7 = sshll.u32 %s415_s3, 4  ;;  %s46_s7 = int_to_ptr.hbm [resolvable:$true] %s45_s7 }
   0x7   :  { %s19_s29 = sshll.u32 %s353_s28, 4  ;;  %s354_s1 = smov [#allocation7]   ;;  %s20_s29 = int_to_ptr.vmem [resolvable:$true] %s19_s29 }
   0x8   :  { %25 = dma.hbm_to_vmem [thread:$0]  %s18_s25, 256, %s20_s29, [#allocation3], %s351_s26, %s351_s26, %s352_s27  }
   0x9   :  { %s47_s8 = sshll.u32 %s354_s1, 4  ;;  %s355_s9 = smov 256   ;;  %s48_s8 = int_to_ptr.vmem [resolvable:$true] %s47_s8 }
   0xa   :  { %s356_s10 = smov 16  }
   0xb   :  { %53 = dma.hbm_to_vmem [thread:$0]  %s46_s7, 4096, %s48_s8, [#allocation6], %s355_s9, %s355_s9, %s356_s10  }
   0xc   :  { %344 = dma.done.wait [#allocation3], 256  }
   0xd   :  { %345 = vsyncadd [#allocation3], 4294967040 }
   0xe   :  { %346 = dma.done.wait [#allocation6], 6144  }
   0xf   :  { %347 = vsyncadd [#allocation6], 4294961152  ;;  %v85_v0 = vld [vmem:[#allocation5 + $0x78] sm:$0xff]  ;;  %v84_v1 = vld [vmem:[#allocation5 + $0x70] sm:$0xff]  ;;  %s209_s16 = sshll.u32 %s417_s5, 4  ;;  %s210_s16 = int_to_ptr.hbm [resolvable:$true] %s209_s16 }
  0x10   :  { %90 = vmatpush.msra.mxu0 %v85_v0  ;;  %223 = vmatpush.msra.mxu3 %v85_v0  ;;  %v83_v2 = vld [vmem:[#allocation5 + $0x68] sm:$0xff]  ;;  %v82_v3 = vld [vmem:[#allocation5 + $0x60] sm:$0xff]  ;;  %v81_v4 = vld [vmem:[#allocation5 + $0x58] sm:$0xff] }
  0x11   :  { %v145_v5 = vld [vmem:[#allocation7 + $0xf0] sm:$0xff]  ;;  %v146_v6 = vld [vmem:[#allocation7 + $0xf8] sm:$0xff]  ;;  %v143_v7 = vld [vmem:[#allocation7 + $0xe0] sm:$0xff] }
  0x12   :  { %91 = vmatpush.msra.mxu0 %v84_v1  ;;  %224 = vmatpush.msra.mxu3 %v84_v1  ;;  %v144_v8 = vld [vmem:[#allocation7 + $0xe8] sm:$0xff]  ;;  %v80_v9 = vld [vmem:[#allocation5 + $0x50] sm:$0xff]  ;;  %v142_v11 = vld [vmem:[#allocation7 + $0xd8] sm:$0xff] }
  0x13   :  { %153 = vmatpush.msra.mxu1 %v145_v5  ;;  %176 = vmatpush.msra.mxu2 %v146_v6  ;;  %v141_v10 = vld [vmem:[#allocation7 + $0xd0] sm:$0xff]  ;;  %v79_v12 = vld [vmem:[#allocation5 + $0x48] sm:$0xff]  ;;  %v139_v13 = vld [vmem:[#allocation7 + $0xc0] sm:$0xff] }
  0x14   :  { %92 = vmatpush.msra.mxu0 %v83_v2  ;;  %225 = vmatpush.msra.mxu3 %v83_v2  ;;  %v140_v14 = vld [vmem:[#allocation7 + $0xc8] sm:$0xff]  ;;  %v78_v15 = vld [vmem:[#allocation5 + $0x40] sm:$0xff]  ;;  %v137_v16 = vld [vmem:[#allocation7 + $0xb0] sm:$0xff] }
  0x15   :  { %154 = vmatpush.msra.mxu1 %v143_v7  ;;  %177 = vmatpush.msra.mxu2 %v144_v8  ;;  %v138_v17 = vld [vmem:[#allocation7 + $0xb8] sm:$0xff]  ;;  %v135_v19 = vld [vmem:[#allocation7 + $0xa0] sm:$0xff]  ;;  %v136_v20 = vld [vmem:[#allocation7 + $0xa8] sm:$0xff] }
  0x16   :  { %93 = vmatpush.msra.mxu0 %v82_v3  ;;  %226 = vmatpush.msra.mxu3 %v82_v3  ;;  %v77_v18 = vld [vmem:[#allocation5 + $0x38] sm:$0xff]  ;;  %v76_v21 = vld [vmem:[#allocation5 + $0x30] sm:$0xff]  ;;  %v75_v24 = vld [vmem:[#allocation5 + $0x28] sm:$0xff] }
  0x17   :  { %155 = vmatpush.msra.mxu1 %v141_v10  ;;  %178 = vmatpush.msra.mxu2 %v142_v11  ;;  %v133_v22 = vld [vmem:[#allocation7 + $0x90] sm:$0xff]  ;;  %v134_v23 = vld [vmem:[#allocation7 + $0x98] sm:$0xff]  ;;  %v131_v25 = vld [vmem:[#allocation7 + $0x80] sm:$0xff] }
  0x18   :  { %94 = vmatpush.msra.mxu0 %v81_v4  ;;  %227 = vmatpush.msra.mxu3 %v81_v4  ;;  %v132_v26 = vld [vmem:[#allocation7 + $0x88] sm:$0xff]  ;;  %v74_v27 = vld [vmem:[#allocation5 + $0x20] sm:$0xff]  ;;  %v129_v28 = vld [vmem:[#allocation7 + $0x70] sm:$0xff] }
  0x19   :  { %156 = vmatpush.msra.mxu1 %v139_v13  ;;  %179 = vmatpush.msra.mxu2 %v140_v14  ;;  %v130_v29 = vld [vmem:[#allocation7 + $0x78] sm:$0xff]  ;;  %v127_v31 = vld [vmem:[#allocation7 + $0x60] sm:$0xff]  ;;  %v128_v32 = vld [vmem:[#allocation7 + $0x68] sm:$0xff] }
  0x1a   :  { %95 = vmatpush.msra.mxu0 %v80_v9  ;;  %228 = vmatpush.msra.mxu3 %v80_v9  ;;  %v73_v30 = vld [vmem:[#allocation5 + $0x18] sm:$0xff]  ;;  %v72_v33 = vld [vmem:[#allocation5 + $0x10] sm:$0xff]  ;;  %v71_v36 = vld [vmem:[#allocation5 + $0x8] sm:$0xff] }
  0x1b   :  { %157 = vmatpush.msra.mxu1 %v137_v16  ;;  %180 = vmatpush.msra.mxu2 %v138_v17  ;;  %v125_v34 = vld [vmem:[#allocation7 + $0x50] sm:$0xff]  ;;  %v126_v35 = vld [vmem:[#allocation7 + $0x58] sm:$0xff]  ;;  %v123_v37 = vld [vmem:[#allocation7 + $0x40] sm:$0xff] }
  0x1c   :  { %96 = vmatpush.msra.mxu0 %v79_v12  ;;  %229 = vmatpush.msra.mxu3 %v79_v12  ;;  %v124_v38 = vld [vmem:[#allocation7 + $0x48] sm:$0xff]  ;;  %v70_v39 = vld [vmem:[#allocation5] sm:$0xff]  ;;  %v68_v40 = vld [vmem:[#allocation2] sm:$0xff] }
  0x1d   :  { %158 = vmatpush.msra.mxu1 %v135_v19  ;;  %181 = vmatpush.msra.mxu2 %v136_v20  ;;  %v69_v41 = vld [vmem:[#allocation2 + $0x8] sm:$0xff]  ;;  %v121_v42 = vld [vmem:[#allocation7 + $0x30] sm:$0xff]  ;;  %v119_v44 = vld [vmem:[#allocation7 + $0x20] sm:$0xff] }
  0x1e   :  { %97 = vmatpush.msra.mxu0 %v78_v15  ;;  %230 = vmatpush.msra.mxu3 %v78_v15  ;;  %v122_v43 = vld [vmem:[#allocation7 + $0x38] sm:$0xff]  ;;  %v120_v45 = vld [vmem:[#allocation7 + $0x28] sm:$0xff]  ;;  %v117_v46 = vld [vmem:[#allocation7 + $0x10] sm:$0xff] }
  0x1f   :  { %159 = vmatpush.msra.mxu1 %v133_v22  ;;  %182 = vmatpush.msra.mxu2 %v134_v23  ;;  %v118_v47 = vld [vmem:[#allocation7 + $0x18] sm:$0xff]  ;;  %v115_v48 = vld [vmem:[#allocation7] sm:$0xff]  ;;  %v116_v49 = vld [vmem:[#allocation7 + $0x8] sm:$0xff] }
  0x20   :  { %98 = vmatpush.msra.mxu0 %v77_v18  ;;  %231 = vmatpush.msra.mxu3 %v77_v18  ;;  %v247_v50 = vld [vmem:[%s414_s2] ss:$0 sm:$0xff]  ;;  %s357_s2 = smov [#allocation8]  }
  0x21   :  { %160 = vmatpush.msra.mxu1 %v131_v25  ;;  %183 = vmatpush.msra.mxu2 %v132_v26  ;;  %v147_v57 = vld [vmem:[%s416_s4] sm:$0x3]  ;;  %s207_s13 = sshll.u32 %s357_s2, 4  ;;  %s208_s13 = int_to_ptr.vmem [resolvable:$true] %s207_s13 }
  0x22   :  { %99 = vmatpush.msra.mxu0 %v76_v21  ;;  %232 = vmatpush.msra.mxu3 %v76_v21  ;;  %v149_v58 = vperm.slane %v147_v57, 0  ;;  %v150_v61 = vperm.slane %v147_v57, 1 }
  0x23   :  { %161 = vmatpush.msra.mxu1 %v129_v28  ;;  %184 = vmatpush.msra.mxu2 %v130_v29 }
  0x24   :  { %100 = vmatpush.msra.mxu0 %v75_v24  ;;  %233 = vmatpush.msra.mxu3 %v75_v24 }
  0x25   :  { %162 = vmatpush.msra.mxu1 %v127_v31  ;;  %185 = vmatpush.msra.mxu2 %v128_v32 }
  0x26   :  { %101 = vmatpush.msra.mxu0 %v74_v27  ;;  %234 = vmatpush.msra.mxu3 %v74_v27 }
  0x27   :  { %163 = vmatpush.msra.mxu1 %v125_v34  ;;  %186 = vmatpush.msra.mxu2 %v126_v35 }
  0x28   :  { %102 = vmatpush.msra.mxu0 %v73_v30  ;;  %235 = vmatpush.msra.mxu3 %v73_v30 }
  0x29   :  { %164 = vmatpush.msra.mxu1 %v123_v37  ;;  %187 = vmatpush.msra.mxu2 %v124_v38 }
  0x2a   :  { %103 = vmatpush.msra.mxu0 %v72_v33  ;;  %236 = vmatpush.msra.mxu3 %v72_v33 }
  0x2b   :  { %165 = vmatpush.msra.mxu1 %v121_v42  ;;  %188 = vmatpush.msra.mxu2 %v122_v43 }
  0x2c   :  { %104 = vmatpush.msra.mxu0 %v71_v36  ;;  %237 = vmatpush.msra.mxu3 %v71_v36 }
  0x2d   :  { %166 = vmatpush.msra.mxu1 %v119_v44  ;;  %189 = vmatpush.msra.mxu2 %v120_v45 }
  0x2e   :  { %105 = vmatpush.msra.mxu0 %v70_v39  ;;  %238 = vmatpush.msra.mxu3 %v70_v39 }
  0x2f   :  { %106 = vmatmul.f32.vlgmr.msra.gmra.mxu0 %v68_v40  ;;  %109 = vmatmul.f32.vlgmr.msra.gmra.mxu3 %v69_v41 }
  0x30   :  { %167 = vmatpush.msra.mxu1 %v117_v46  ;;  %190 = vmatpush.msra.mxu2 %v118_v47 }
  0x32   :  { %168 = vmatpush.msra.mxu1 %v115_v48  ;;  %191 = vmatpush.msra.mxu2 %v116_v49 }
  0xac   :  { %v107_v51 = vpop.f32.mrf.mxu0 }
  0xad   :  { %v108_v52 = vadd.f32 %v247_v50, %v107_v51 }
  0xaf   :  { %v113_v53 = vmax.f32 %v108_v52, 0.0 }
  0xb1   :  { %169 = vmatmul.f32.vlgmr.msra.gmra.mxu1 %v113_v53  ;;  %192 = vmatmul.f32.vlgmr.msra.gmra.mxu2 %v113_v53 }
  0xb2   :  { %v110_v54 = vpop.f32.mrf.mxu3 }
  0xb3   :  { %v111_v55 = vadd.f32 %v247_v50, %v110_v54 }
  0xb5   :  { %v114_v56 = vmax.f32 %v111_v55, 0.0 }
  0xb9   :  { %172 = vmatmul.f32.gmra.mxu1 %v114_v56  ;;  %195 = vmatmul.f32.gmra.mxu2 %v114_v56 }
 0x12e   :  { %v170_v59 = vpop.f32.mrf.mxu1 }
 0x12f   :  { %v171_v60 = vadd.f32 %v170_v59, %v149_v58 }
 0x131   :  { %199 = vst [vmem:[#allocation8] sm:$0xff] %v171_v60 }
 0x134   :  { %v193_v62 = vpop.f32.mrf.mxu2 }
 0x135   :  { %v194_v63 = vadd.f32 %v193_v62, %v150_v61 }
 0x136   :  { %v173_v0 = vpop.f32.mrf.mxu1 }
 0x137   :  { %200 = vst [vmem:[#allocation8 + $0x8] sm:$0xff] %v194_v63  ;;  %v174_v1 = vadd.f32 %v173_v0, %v149_v58 }
 0x139   :  { %201 = vst [vmem:[#allocation8 + $0x10] sm:$0xff] %v174_v1 }
 0x13c   :  { %v196_v2 = vpop.f32.mrf.mxu2 }
 0x13d   :  { %v197_v3 = vadd.f32 %v196_v2, %v150_v61 }
 0x13f   :  { %202 = vst [vmem:[#allocation8 + $0x18] sm:$0xff] %v197_v3 }
 0x140   :  { %215 = dma.vmem_to_hbm [thread:$0]  %s208_s13, 512, %s210_s16, [#allocation4], %s355_s9, %s355_s9, %s356_s10  }
 0x141   :  { %348 = dma.done.wait [#allocation4], 512  }
 0x142   :  { %349 = vsyncadd [#allocation4], 4294966784 }
 0x143   :  { %220 = vsyncpa [#allocation3], 1 }
 0x144   :  { %221 = vsyncpa [#allocation6], 1 }
 0x145   :  { %222 = vsyncpa [#allocation4], 1 }

</bundles_post_ra>
